<compile_context>
chip_gen: v5e
topology: v5e:2x2
jax: 0.10.0
libtpu: 0.0.40
codegen_flags: <defaults>
</compile_context>

<pallas_src>
import functools

import jax
import jax.numpy as jnp
from jax.experimental import pallas as pl
from jax.experimental.pallas import tpu as pltpu


def _latent_kernel(xy_ref, w1_ref, w2_ref, w3_ref, wl_ref, b_ref,
                   mu_ref, sigma_ref, *, B, N, H, R, Z):
    """Single-invocation, fully VMEM-resident forward pass.

    xy_ref : (B*N, x_dim + y_dim)   concatenated context inputs
    w1_ref : (x_dim + y_dim, H)
    w2_ref : (H, H)
    w3_ref : (H, R)
    wl_ref : (R, 2*Z)
    b_ref  : (4, Wmax)  rows = [b1 | b2 | b3 | bl], zero-padded to Wmax lanes
    mu_ref, sigma_ref : (B, Z)
    """
    # Static row/lane slices of the packed bias buffer are free (single-tile loads).
    b1 = b_ref[0:1, :H]
    b2 = b_ref[1:2, :H]
    b3 = b_ref[2:3, :R]
    bl = b_ref[3:4, :2 * Z]

    # Layer 1: one K=(x_dim+y_dim) MXU contraction against the concatenated input.
    h = jnp.dot(xy_ref[...], w1_ref[...], preferred_element_type=jnp.float32)
    h = jnp.maximum(h + b1, 0.0)

    # Layer 2.
    h = jnp.dot(h, w2_ref[...], preferred_element_type=jnp.float32)
    h = jnp.maximum(h + b2, 0.0)

    # Context mean, folded BEFORE the (linear) third layer:
    #   mean_n(h @ w3 + b3) == mean_n(h) @ w3 + b3.
    # Computed reshape-free as a tiny block-averaging matmul (B, B*N) @ (B*N, H)
    # so no in-kernel reshape / hidden VMEM relayout is needed.
    col = jax.lax.broadcasted_iota(jnp.int32, (B, B * N), 1)
    row = jax.lax.broadcasted_iota(jnp.int32, (B, B * N), 0)
    in_group = (col >= row * N) & (col < (row + 1) * N)
    avg = jnp.where(in_group, 1.0 / N, 0.0).astype(jnp.float32)
    h_mean = jnp.dot(avg, h, preferred_element_type=jnp.float32)          # (B, H)

    r = jnp.dot(h_mean, w3_ref[...],
                preferred_element_type=jnp.float32) + b3                  # (B, R)

    # Latent-params linear. Row-major lane split matches torch's view(B, 2, -1):
    # first Z lanes == mu, last Z lanes == log_sigma.
    lp = jnp.dot(r, wl_ref[...], preferred_element_type=jnp.float32) + bl  # (B, 2Z)
    mu_ref[...] = lp[:, :Z]
    sigma_ref[...] = 0.1 + 0.9 * jax.nn.sigmoid(lp[:, Z:])


def pack_params(params):
    """One-time (init-time) packing: stack the four bias rows into a single
    (4, Wmax) buffer so the kernel takes 6 operands / DMAs instead of 11."""
    w1, b1, w2, b2, w3, b3, wl, bl = params
    wmax = max(b.shape[-1] for b in (b1, b2, b3, bl))

    def pad(b):
        b = b.reshape(1, -1).astype(jnp.float32)
        return jnp.pad(b, ((0, 0), (0, wmax - b.shape[-1])))

    b_stack = jnp.concatenate([pad(b1), pad(b2), pad(b3), pad(bl)], axis=0)  # (4, Wmax)
    return (w1.astype(jnp.float32), w2.astype(jnp.float32),
            w3.astype(jnp.float32), wl.astype(jnp.float32), b_stack)


def latent_forward(x, y, packed_params):
    """x: (B, N, x_dim), y: (B, N, y_dim) -> (mu, sigma), each (B, z_dim)."""
    w1, w2, w3, wl, b_stack = packed_params
    B, N, x_dim = x.shape
    y_dim = y.shape[-1]
    in_dim = x_dim + y_dim
    H = w2.shape[0]
    R = w3.shape[1]
    Z = wl.shape[1] // 2

    # Concatenate x||y once in the wrapper (256 B at these sizes) so layer 1 is
    # a single contraction and the kernel gets one activation operand.
    xy = jnp.concatenate([x, y], axis=-1).reshape(B * N, in_dim).astype(jnp.float32)

    flops = (2 * B * N * in_dim * H        # layer 1
             + 2 * B * N * H * H           # layer 2
             + 2 * B * (B * N) * H         # context-mean matmul
             + 2 * B * H * R               # layer 3 (post-mean)
             + 2 * B * R * 2 * Z)          # latent params
    bytes_accessed = 4 * (xy.size + w1.size + w2.size + w3.size + wl.size
                          + b_stack.size + 2 * B * Z)

    vmem = pl.BlockSpec(memory_space=pltpu.MemorySpace.VMEM)
    mu, sigma = pl.pallas_call(
        functools.partial(_latent_kernel, B=B, N=N, H=H, R=R, Z=Z),
        out_shape=(jax.ShapeDtypeStruct((B, Z), jnp.float32),
                   jax.ShapeDtypeStruct((B, Z), jnp.float32)),
        in_specs=[vmem] * 6,
        out_specs=(vmem, vmem),
        cost_estimate=pl.CostEstimate(flops=flops,
                                      transcendentals=B * Z,
                                      bytes_accessed=bytes_accessed),
    )(xy, w1, w2, w3, wl, b_stack)
    return mu, sigma


def _reference(x, y, params):
    w1, b1, w2, b2, w3, b3, wl, bl = params
    inp = jnp.concatenate([x, y], axis=-1)
    h = jnp.maximum(inp @ w1 + b1, 0.0)
    h = jnp.maximum(h @ w2 + b2, 0.0)
    r = h @ w3 + b3
    r = r.mean(axis=1)
    lp = r @ wl + bl
    lp = lp.reshape(lp.shape[0], 2, -1)
    mu, log_sigma = lp[:, 0], lp[:, 1]
    sigma = 0.1 + 0.9 * jax.nn.sigmoid(log_sigma)
    return mu, sigma


def _init_params(key, in_dim, hidden, r_dim, z_dim):
    ks = jax.random.split(key, 8)

    def lin(kw, kb, fan_in, fan_out):
        bound = 1.0 / jnp.sqrt(fan_in)
        w = jax.random.uniform(kw, (fan_in, fan_out), jnp.float32, -bound, bound)
        b = jax.random.uniform(kb, (1, fan_out), jnp.float32, -bound, bound)
        return w, b

    w1, b1 = lin(ks[0], ks[1], in_dim, hidden)
    w2, b2 = lin(ks[2], ks[3], hidden, hidden)
    w3, b3 = lin(ks[4], ks[5], hidden, r_dim)
    wl, bl = lin(ks[6], ks[7], r_dim, 2 * z_dim)
    return (w1, b1, w2, b2, w3, b3, wl, bl)


if __name__ == "__main__":
    B, N = 2, 8          # batch, context points
    x_dim, y_dim = 3, 1  # feature dims of x and y
    hidden, r_dim, z_dim = 32, 32, 16

    key = jax.random.PRNGKey(0)
    kx, ky, kp = jax.random.split(key, 3)
    x = jax.random.normal(kx, (B, N, x_dim), jnp.float32)
    y = jax.random.normal(ky, (B, N, y_dim), jnp.float32)
    params = _init_params(kp, x_dim + y_dim, hidden, r_dim, z_dim)
    packed = pack_params(params)   # init-time packing (not per call)

    mu, sigma = latent_forward(x, y, packed)
    jax.block_until_ready((mu, sigma))

    mu_ref, sigma_ref = _reference(x, y, params)
    assert jnp.allclose(mu, mu_ref, atol=1e-5, rtol=1e-5)
    assert jnp.allclose(sigma, sigma_ref, atol=1e-5, rtol=1e-5)
    assert bool(jnp.all(sigma > 0.1)) and bool(jnp.all(sigma < 1.0))

    print("KERNEL_OK")
</pallas_src>

<mosaic_0001>
module attributes {stable_mosaic.version = 11 : i64} {
  func.func @_latent_kernel(%arg0: memref<16x4xf32, #tpu.memory_space<vmem>>, %arg1: memref<4x32xf32, #tpu.memory_space<vmem>>, %arg2: memref<32x32xf32, #tpu.memory_space<vmem>>, %arg3: memref<32x32xf32, #tpu.memory_space<vmem>>, %arg4: memref<32x32xf32, #tpu.memory_space<vmem>>, %arg5: memref<4x32xf32, #tpu.memory_space<vmem>>, %arg6: memref<2x16xf32, #tpu.memory_space<vmem>>, %arg7: memref<2x16xf32, #tpu.memory_space<vmem>>) attributes {dimension_semantics = [], scalar_prefetch = 0 : i64, scratch_operands = 0 : i64, tpu.core_type = #tpu.core_type<tc>} {
    %c0 = arith.constant 0 : index
    %c0_0 = arith.constant 0 : index
    %0 = vector.load %arg5[%c0, %c0_0] : memref<4x32xf32, #tpu.memory_space<vmem>>, vector<1x32xf32>
    %c1 = arith.constant 1 : index
    %c0_1 = arith.constant 0 : index
    %1 = vector.load %arg5[%c1, %c0_1] : memref<4x32xf32, #tpu.memory_space<vmem>>, vector<1x32xf32>
    %c2 = arith.constant 2 : index
    %c0_2 = arith.constant 0 : index
    %2 = vector.load %arg5[%c2, %c0_2] : memref<4x32xf32, #tpu.memory_space<vmem>>, vector<1x32xf32>
    %c3 = arith.constant 3 : index
    %c0_3 = arith.constant 0 : index
    %3 = vector.load %arg5[%c3, %c0_3] : memref<4x32xf32, #tpu.memory_space<vmem>>, vector<1x32xf32>
    %c0_4 = arith.constant 0 : index
    %c0_5 = arith.constant 0 : index
    %4 = vector.load %arg0[%c0_4, %c0_5] : memref<16x4xf32, #tpu.memory_space<vmem>>, vector<16x4xf32>
    %c0_6 = arith.constant 0 : index
    %c0_7 = arith.constant 0 : index
    %5 = vector.load %arg1[%c0_6, %c0_7] : memref<4x32xf32, #tpu.memory_space<vmem>>, vector<4x32xf32>
    %cst = arith.constant dense<0.000000e+00> : vector<16x32xf32>
    %6 = tpu.matmul %4, %5, %cst {dimension_numbers = #tpu.dot_dimension_numbers<[1], [0], [0], [1], [0, 0, 1, 1], [], []>} : vector<16x4xf32>, vector<4x32xf32>, vector<16x32xf32> -> vector<16x32xf32>
    %7 = vector.broadcast %0 : vector<1x32xf32> to vector<16x32xf32>
    %8 = arith.addf %6, %7 : vector<16x32xf32>
    %cst_8 = arith.constant 0.000000e+00 : f32
    %9 = vector.broadcast %cst_8 : f32 to vector<16x32xf32>
    %10 = arith.maximumf %8, %9 : vector<16x32xf32>
    %c0_9 = arith.constant 0 : index
    %c0_10 = arith.constant 0 : index
    %11 = vector.load %arg2[%c0_9, %c0_10] : memref<32x32xf32, #tpu.memory_space<vmem>>, vector<32x32xf32>
    %cst_11 = arith.constant dense<0.000000e+00> : vector<16x32xf32>
    %12 = tpu.matmul %10, %11, %cst_11 {dimension_numbers = #tpu.dot_dimension_numbers<[1], [0], [0], [1], [0, 0, 1, 1], [], []>} : vector<16x32xf32>, vector<32x32xf32>, vector<16x32xf32> -> vector<16x32xf32>
    %13 = vector.broadcast %1 : vector<1x32xf32> to vector<16x32xf32>
    %14 = arith.addf %12, %13 : vector<16x32xf32>
    %cst_12 = arith.constant 0.000000e+00 : f32
    %15 = vector.broadcast %cst_12 : f32 to vector<16x32xf32>
    %16 = arith.maximumf %14, %15 : vector<16x32xf32>
    %17 = tpu.iota {dimensions = array<i32: 1>} : vector<2x16xi32>
    %18 = tpu.iota {dimensions = array<i32: 0>} : vector<2x16xi32>
    %c8_i32 = arith.constant 8 : i32
    %19 = vector.broadcast %c8_i32 : i32 to vector<2x16xi32>
    %20 = arith.muli %18, %19 : vector<2x16xi32>
    %21 = arith.cmpi sge, %17, %20 : vector<2x16xi32>
    %c1_i32 = arith.constant 1 : i32
    %22 = vector.broadcast %c1_i32 : i32 to vector<2x16xi32>
    %23 = arith.addi %18, %22 : vector<2x16xi32>
    %c8_i32_13 = arith.constant 8 : i32
    %24 = vector.broadcast %c8_i32_13 : i32 to vector<2x16xi32>
    %25 = arith.muli %23, %24 : vector<2x16xi32>
    %26 = arith.cmpi slt, %17, %25 : vector<2x16xi32>
    %27 = arith.andi %21, %26 : vector<2x16xi1>
    %cst_14 = arith.constant 1.250000e-01 : f32
    %cst_15 = arith.constant 0.000000e+00 : f32
    %28 = vector.broadcast %cst_14 : f32 to vector<2x16xf32>
    %29 = vector.broadcast %cst_15 : f32 to vector<2x16xf32>
    %30 = arith.select %27, %28, %29 : vector<2x16xi1>, vector<2x16xf32>
    %cst_16 = arith.constant dense<0.000000e+00> : vector<2x32xf32>
    %31 = tpu.matmul %30, %16, %cst_16 {dimension_numbers = #tpu.dot_dimension_numbers<[1], [0], [0], [1], [0, 0, 1, 1], [], []>} : vector<2x16xf32>, vector<16x32xf32>, vector<2x32xf32> -> vector<2x32xf32>
    %c0_17 = arith.constant 0 : index
    %c0_18 = arith.constant 0 : index
    %32 = vector.load %arg3[%c0_17, %c0_18] : memref<32x32xf32, #tpu.memory_space<vmem>>, vector<32x32xf32>
    %cst_19 = arith.constant dense<0.000000e+00> : vector<2x32xf32>
    %33 = tpu.matmul %31, %32, %cst_19 {dimension_numbers = #tpu.dot_dimension_numbers<[1], [0], [0], [1], [0, 0, 1, 1], [], []>} : vector<2x32xf32>, vector<32x32xf32>, vector<2x32xf32> -> vector<2x32xf32>
    %34 = vector.broadcast %2 : vector<1x32xf32> to vector<2x32xf32>
    %35 = arith.addf %33, %34 : vector<2x32xf32>
    %c0_20 = arith.constant 0 : index
    %c0_21 = arith.constant 0 : index
    %36 = vector.load %arg4[%c0_20, %c0_21] : memref<32x32xf32, #tpu.memory_space<vmem>>, vector<32x32xf32>
    %cst_22 = arith.constant dense<0.000000e+00> : vector<2x32xf32>
    %37 = tpu.matmul %35, %36, %cst_22 {dimension_numbers = #tpu.dot_dimension_numbers<[1], [0], [0], [1], [0, 0, 1, 1], [], []>} : vector<2x32xf32>, vector<32x32xf32>, vector<2x32xf32> -> vector<2x32xf32>
    %38 = vector.broadcast %3 : vector<1x32xf32> to vector<2x32xf32>
    %39 = arith.addf %37, %38 : vector<2x32xf32>
    %40 = vector.extract_strided_slice %39 {offsets = [0, 0], sizes = [2, 16], strides = [1, 1]} : vector<2x32xf32> to vector<2x16xf32>
    %c0_23 = arith.constant 0 : index
    %c0_24 = arith.constant 0 : index
    %41 = vector.load %arg6[%c0_23, %c0_24] : memref<2x16xf32, #tpu.memory_space<vmem>>, vector<2x16xf32>
    tpu.vector_store %arg6[%c0_23, %c0_24], %40 {strides = array<i32>} : memref<2x16xf32, #tpu.memory_space<vmem>>, vector<2x16xf32>,
    %42 = vector.extract_strided_slice %39 {offsets = [0, 16], sizes = [2, 16], strides = [1, 1]} : vector<2x32xf32> to vector<2x16xf32>
    %43 = arith.negf %42 : vector<2x16xf32>
    %44 = math.exp %43 : vector<2x16xf32>
    %cst_25 = arith.constant 1.000000e+00 : f32
    %45 = vector.broadcast %cst_25 : f32 to vector<2x16xf32>
    %46 = arith.addf %45, %44 : vector<2x16xf32>
    %47 = arith.divf %45, %46 : vector<2x16xf32>
    %cst_26 = arith.constant 0.899999976 : f32
    %48 = vector.broadcast %cst_26 : f32 to vector<2x16xf32>
    %49 = arith.mulf %48, %47 : vector<2x16xf32>
    %cst_27 = arith.constant 1.000000e-01 : f32
    %50 = vector.broadcast %cst_27 : f32 to vector<2x16xf32>
    %51 = arith.addf %50, %49 : vector<2x16xf32>
    %c0_28 = arith.constant 0 : index
    %c0_29 = arith.constant 0 : index
    %52 = vector.load %arg7[%c0_28, %c0_29] : memref<2x16xf32, #tpu.memory_space<vmem>>, vector<2x16xf32>
    tpu.vector_store %arg7[%c0_28, %c0_29], %51 {strides = array<i32>} : memref<2x16xf32, #tpu.memory_space<vmem>>, vector<2x16xf32>,
    return
  }
}

</mosaic_0001>

<bundles_post_ra>
// kernel: tpu_custom_call.1
= control target key start
LH: loop header
LB: loop body
LE: loop exit
PB: predicated region body
PF: predicated region fallthrough
CT: control target
= control target key end

     0   :  { %13 = vsyncpa [#allocation3], 0  ;;  %s553_s0 = inlined_call_operand.vmem [shape: f32[16,4], index: 0, kind: input, shape index: {}]   ;;  %s554_s1 = inlined_call_operand.vmem [shape: f32[4,32], index: 1, kind: input, shape index: {}]   ;;  %s555_s2 = inlined_call_operand.hbm [shape: f32[32,32], index: 2, kind: input, shape index: {}]   ;;  %s556_s3 = inlined_call_operand.hbm [shape: f32[32,32], index: 3, kind: input, shape index: {}]   ;;  %s557_s4 = inlined_call_operand.hbm [shape: f32[32,32], index: 4, kind: input, shape index: {}]   ;;  %s558_s5 = inlined_call_operand.vmem [shape: f32[4,32], index: 5, kind: input, shape index: {}]   ;;  %s559_s6 = inlined_call_operand.hbm [shape: f32[2,16], index: 6, kind: output, shape index: {0}]   ;;  %s560_s7 = inlined_call_operand.hbm [shape: f32[2,16], index: 7, kind: output, shape index: {1}]  }
   0x1   :  { %14 = vsyncpa [#allocation6], 0 }
   0x2   :  { %15 = vsyncpa [#allocation4], 0 }
   0x3   :  { %16 = vsyncpa [#allocation10], 0  ;;  %s38_s26 = sshll.u32 %s556_s3, 4  ;;  %s462_s27 = smov [#allocation5]   ;;  %s39_s26 = int_to_ptr.hbm [resolvable:$true] %s38_s26 }
   0x4   :  { %s40_s28 = sshll.u32 %s462_s27, 4  ;;  %s25_s8 = sshll.u32 %s555_s2, 4  ;;  %s41_s28 = int_to_ptr.vmem [resolvable:$true] %s40_s28  ;;  %s26_s8 = int_to_ptr.hbm [resolvable:$true] %s25_s8 }
   0x5   :  { %s463_s9 = smov 128   ;;  %s464_s10 = smov 8  }
   0x6   :  { %46 = dma.hbm_to_vmem [thread:$0]  %s39_s26, 512, %s41_s28, [#allocation6], %s463_s9, %s463_s9, %s464_s10  }
   0x7   :  { %s465_s11 = smov [#allocation2]   ;;  %s51_s15 = sshll.u32 %s557_s4, 4  ;;  %s52_s15 = int_to_ptr.hbm [resolvable:$true] %s51_s15 }
   0x8   :  { %s27_s12 = sshll.u32 %s465_s11, 4  ;;  %s466_s3 = smov [#allocation7]   ;;  %s28_s12 = int_to_ptr.vmem [resolvable:$true] %s27_s12 }
   0x9   :  { %33 = dma.hbm_to_vmem [thread:$0]  %s26_s8, 512, %s28_s12, [#allocation3], %s463_s9, %s463_s9, %s464_s10  }
   0xa   :  { %s53_s16 = sshll.u32 %s466_s3, 4  ;;  %s54_s16 = int_to_ptr.vmem [resolvable:$true] %s53_s16 }
   0xb   :  { %59 = dma.hbm_to_vmem [thread:$0]  %s52_s15, 512, %s54_s16, [#allocation6], %s463_s9, %s463_s9, %s464_s10  }
   0xc   :  { %454 = dma.done.wait [#allocation3], 512  }
   0xd   :  { %455 = vsyncadd [#allocation3], 4294966784 }
   0xe   :  { %456 = dma.done.wait [#allocation6], 1024  }
   0xf   :  { %457 = vsyncadd [#allocation6], 4294966272  ;;  %vm89_vm0 = vcmask 1043456   ;;  %vm82_vm1 = vcmask 31744   ;;  %v80_v0 = vld [vmem:[%s554_s1] sm:$0xf]  ;;  %v155_v17 = vlaneseq }
  0x10   :  { %v78_v1 = vld [vmem:[%s553_s0] sm:$0xff]  ;;  %308 = vmatpush.msk.msra.mxu0 %vm89_vm0, %v80_v0  ;;  %v121_v2 = vld [vmem:[#allocation2 + $0x18] sm:$0xff]  ;;  %v79_v3 = vld [vmem:[%s553_s0 + $0x8] sm:$0xff]  ;;  %vm123_vm2 = vcmask 261120   ;;  %v467_v30 = vmov 0.0   ;;  %vm166_vm6 = vcmask 130048  }
  0x11   :  { %309 = vmatmul.msk.f32.vlgmr.msra.gmra.mxu0 %vm82_vm1, %v78_v1  ;;  %142 = vmatpush.msra.mxu1 %v121_v2  ;;  %v120_v4 = vld [vmem:[#allocation2 + $0x10] sm:$0xff]  ;;  %v119_v5 = vld [vmem:[#allocation2 + $0x8] sm:$0xff]  ;;  %v118_v6 = vld [vmem:[#allocation2] sm:$0xff]  ;;  %v158_v18 = vshrl.u32 %v155_v17, 7  ;;  %v156_v21 = vand.u32 127, %v155_v17  ;;  %vm246_vm7 = vcmask 123904  }
  0x12   :  { %v326_v7 = vld [vmem:[%s558_s5] ss:$0 sm:$0xff]  ;;  %v193_v14 = vld [vmem:[#allocation5 + $0x18] sm:$0xff]  ;;  %v192_v15 = vld [vmem:[#allocation5 + $0x10] sm:$0xff]  ;;  %s468_s27 = smov [#allocation8]   ;;  %s281_s8 = sshll.u32 %s559_s6, 4  ;;  %s282_s8 = int_to_ptr.hbm [resolvable:$true] %s281_s8 }
  0x13   :  { %143 = vmatpush.msra.mxu1 %v120_v4  ;;  %210 = vmatpush.msra.mxu3 %v193_v14  ;;  %v191_v16 = vld [vmem:[#allocation5 + $0x8] sm:$0xff]  ;;  %v161_v19 = vadd.s32 1, %v158_v18  ;;  %v159_v22 = vmul.u32 8, %v158_v18  ;;  %v327_v24 = vld [vmem:[%s558_s5 + $0x1] ss:$0 sm:$0xff]  ;;  %v221_v33 = vld [vmem:[#allocation7 + $0x18] sm:$0xff] }
  0x14   :  { %v190_v32 = vld [vmem:[#allocation5] sm:$0xff]  ;;  %v220_v34 = vld [vmem:[#allocation7 + $0x10] sm:$0xff]  ;;  %v219_v35 = vld [vmem:[#allocation7 + $0x8] sm:$0xff]  ;;  %s279_s28 = sshll.u32 %s468_s27, 4  ;;  %s470_s6 = smov [#allocation9]   ;;  %s280_s28 = int_to_ptr.vmem [resolvable:$true] %s279_s28 }
  0x15   :  { %144 = vmatpush.msra.mxu1 %v119_v5  ;;  %211 = vmatpush.msra.mxu3 %v192_v15  ;;  %v162_v23 = vmul.u32 8, %v161_v19  ;;  %vm160_vm3 = vcmp.ge.s32.totalorder %v156_v21, %v159_v22  ;;  %v218_v37 = vld [vmem:[#allocation7] sm:$0xff]  ;;  %s290_s9 = sshll.u32 %s470_s6, 4  ;;  %s292_s12 = sshll.u32 %s560_s7, 4  ;;  %s291_s9 = int_to_ptr.vmem [resolvable:$true] %s290_s9  ;;  %s293_s12 = int_to_ptr.hbm [resolvable:$true] %s292_s12 }
  0x16   :  { %v328_v38 = vld [vmem:[%s558_s5 + $0x2] ss:$0 sm:$0xff]  ;;  %v329_v41 = vld [vmem:[%s558_s5 + $0x3] ss:$0 sm:$0xff]  ;;  %s469_s5 = smov 112  }
  0x17   :  { %145 = vmatpush.msra.mxu1 %v118_v6  ;;  %212 = vmatpush.msra.mxu3 %v191_v16  ;;  %vm163_vm4 = vcmp.lt.s32.totalorder %v156_v21, %v162_v23 }
  0x18   :  { %vm164_vm5 = vmand %vm160_vm3, %vm163_vm4 }
  0x19   :  { %310 = vmatmul.msk.f32.gmra.mxu0 %vm82_vm1, %v79_v3  ;;  %v165_v31 = vsel %vm164_vm5, 0.125, %v467_v30  ;;  %213 = vmatpush.msra.mxu3 %v190_v32 }
  0x8e   :  { %v110_v8 = vpop.f32.mrf.mxu0 }
  0x8f   :  { %v111_v9 = vadd.f32 %v326_v7, %v110_v8 }
  0x91   :  { %v116_v10 = vmax.f32 %v111_v9, 0.0 }
  0x93   :  { %311 = vmatmul.msk.f32.vlgmr.msra.gmra.mxu1 %vm123_vm2, %v116_v10 }
  0x96   :  { %v113_v11 = vpop.f32.mrf.mxu0 }
  0x97   :  { %v114_v12 = vadd.f32 %v326_v7, %v113_v11 }
  0x99   :  { %v117_v13 = vmax.f32 %v114_v12, 0.0 }
  0x9b   :  { %312 = vmatmul.msk.f32.gmra.mxu1 %vm123_vm2, %v117_v13 }
 0x110   :  { %v147_v20 = vpop.f32.mrf.mxu1 }
 0x111   :  { %v148_v26 = vadd.f32 %v327_v24, %v147_v20 }
 0x113   :  { %v153_v29 = vmax.f32 %v148_v26, 0.0 }
 0x118   :  { %v150_v25 = vpop.f32.mrf.mxu1 }
 0x119   :  { %v151_v27 = vadd.f32 %v327_v24, %v150_v25 }
 0x11b   :  { %v154_v28 = vmax.f32 %v151_v27, 0.0 }
 0x11d   :  { %184 = vmatpush.msra.mxu2 %v154_v28 }
 0x11f   :  { %185 = vmatpush.msra.mxu2 %v153_v29 }
 0x120   :  { %313 = vmatmul.msk.f32.vlgmr.msra.gmra.mxu2 %vm166_vm6, %v165_v31 }
 0x121   :  { %238 = vmatpush.msrb.mxu2 %v221_v33 }
 0x123   :  { %239 = vmatpush.msrb.mxu2 %v220_v34 }
 0x125   :  { %240 = vmatpush.msrb.mxu2 %v219_v35 }
 0x127   :  { %241 = vmatpush.msrb.mxu2 %v218_v37 }
 0x1a3   :  { %v187_v36 = vpop.f32.mrf.mxu2 }
 0x1a4   :  { %314 = vmatmul.msk.f32.vlgmr.msra.gmra.mxu3 %vm123_vm2, %v187_v36 }
 0x227   :  { %v215_v39 = vpop.f32.mrf.mxu3 }
 0x228   :  { %v216_v40 = vadd.f32 %v328_v38, %v215_v39 }
 0x22a   :  { %315 = vmatmul.msk.f32.vlgmr.msrb.gmra.mxu2 %vm123_vm2, %v216_v40 }
 0x2ad   :  { %v243_v42 = vpop.f32.mrf.mxu2 }
 0x2ae   :  { %v244_v43 = vadd.f32 %v329_v41, %v243_v42 }
 0x2b0   :  { %v316_v44 = vmul.f32 -1.442695, %v244_v43  ;;  %247 = vst.msk [vmem:[#allocation8] sm:$0x3] %vm246_vm7, %v244_v43 }
 0x2b1   :  { %284 = dma.vmem_to_hbm [thread:$0]  %s280_s28, 32, %s282_s8, [#allocation4]  }
 0x2b2   :  { %330 = vpow2.f32 %v316_v44 }
 0x2b8   :  { %v331_v45 = vpop.eup %330 }
 0x2b9   :  { %v251_v46 = vadd.f32 1.0, %v331_v45 }
 0x2bb   :  { %332 = vrcp.f32 %v251_v46  ;;  %v263_v50 = vand.u32 2147483648, %v251_v46  ;;  %v261_v52 = vand.u32 2147483647, %v251_v46  ;;  %vm257_vm9 = vweird.f32 %v251_v46 }
 0x2bd   :  { %v264_v54 = vor.u32 1.1754944e-38, %v263_v50  ;;  %vm262_vm11 = vcmp.eq.f32.partialorder %v261_v52, 8.507059e+37 }
 0x2c1   :  { %v333_v47 = vpop.eup %332 }
 0x2c2   :  { %v253_v48 = vmul.f32 %v333_v47, %v251_v46  ;;  %vm258_vm8 = vweird.f32 %v333_v47 }
 0x2c3   :  { %vm259_vm10 = vmor %vm257_vm9, %vm258_vm8 }
 0x2c4   :  { %v254_v49 = vsub.f32 1.0, %v253_v48 }
 0x2c6   :  { %v255_v51 = vmul.f32 %v333_v47, %v254_v49 }
 0x2c8   :  { %v256_v53 = vadd.f32 %v333_v47, %v255_v51 }
 0x2ca   :  { %v260_v55 = vsel %vm259_vm10, %v333_v47, %v256_v53 }
 0x2cb   :  { %v265_v56 = vsel %vm262_vm11, %v264_v54, %v260_v55 }
 0x2cc   :  { %v267_v57 = vmul.f32 0.9, %v265_v56 }
 0x2ce   :  { %v268_v58 = vadd.f32 0.1, %v267_v57 }
 0x2d0   :  { %270 = vrot.lane.b32.xlu0 %v268_v58, %s469_s5 }
 0x342   :  { %v271_v59 = vpop.permute.xlu0 %270 }
 0x343   :  { %273 = vst.msk [vmem:[#allocation9] sm:$0x3] %vm246_vm7, %v271_v59 }
 0x344   :  { %295 = dma.vmem_to_hbm [thread:$0]  %s291_s9, 32, %s293_s12, [#allocation10]  }
 0x345   :  { %458 = dma.done.wait [#allocation4], 32  }
 0x346   :  { %459 = vsyncadd [#allocation4], 4294967264 }
 0x347   :  { %460 = dma.done.wait [#allocation10], 32  }
 0x348   :  { %461 = vsyncadd [#allocation10], 4294967264 }
 0x349   :  { %304 = vsyncpa [#allocation3], 1 }
 0x34a   :  { %305 = vsyncpa [#allocation6], 1 }
 0x34b   :  { %306 = vsyncpa [#allocation4], 1 }
 0x34c   :  { %307 = vsyncpa [#allocation10], 1 }

</bundles_post_ra>
